<compile_context>
chip_gen: v5e
topology: v5e:2x2
jax: 0.10.0
libtpu: 0.0.40
codegen_flags: <defaults>
</compile_context>

<pallas_src>
import jax
import jax.numpy as jnp
from jax.experimental import pallas as pl
from jax.experimental.pallas import tpu as pltpu


# ----------------------------- Pallas kernel -------------------------------

def _residual_block_kernel(x_ref, w1_ref, w2_ref, o_ref):
    x = x_ref[...]                                                    # (tm, C)
    h = jnp.maximum(
        jnp.dot(x, w1_ref[...], preferred_element_type=jnp.float32), 0.0)
    tt = jnp.maximum(
        jnp.dot(h, w2_ref[...], preferred_element_type=jnp.float32), 0.0)
    o_ref[...] = (x + tt).astype(o_ref.dtype)


# ------------------------------ JAX wrapper --------------------------------

def _round_up(v, m):
    return ((v + m - 1) // m) * m


def residual_block_forward(x, w1, w2, *, block_m=256):
    """x: (..., C) -> (..., C); w1, w2: (C, C) in (in, out) layout."""
    orig_shape = x.shape
    C = orig_shape[-1]
    assert w1.shape == (C, C) and w2.shape == (C, C)

    # Batch the matmul across all leading dims (one big (M, C) @ (C, C)).
    x2 = x.reshape(-1, C).astype(jnp.float32)
    M = x2.shape[0]

    # Row tile: multiple of 8 (sublane), capped at block_m; pad M to a
    # multiple of the tile (padded rows are zeros -> output rows are zeros,
    # sliced away below).
    tm = min(block_m, _round_up(M, 8))
    m_pad = _round_up(M, tm)
    if m_pad != M:
        x2 = jnp.pad(x2, ((0, m_pad - M), (0, 0)))

    out = pl.pallas_call(
        _residual_block_kernel,
        grid=(m_pad // tm,),
        in_specs=[
            pl.BlockSpec((tm, C), lambda i: (i, 0)),        # x row tile
            pl.BlockSpec((C, C), lambda i: (0, 0)),         # W1 (resident)
            pl.BlockSpec((C, C), lambda i: (0, 0)),         # W2 (resident)
        ],
        out_specs=pl.BlockSpec((tm, C), lambda i: (i, 0)),
        out_shape=jax.ShapeDtypeStruct((m_pad, C), jnp.float32),
        compiler_params=pltpu.CompilerParams(
            dimension_semantics=("parallel",)),
    )(x2, w1, w2)

    return out[:M].reshape(orig_shape)


# ----------------------------- pure-JAX reference --------------------------

def ref_forward(x, w1, w2):
    h = jnp.maximum(x @ w1, 0.0)
    tt = jnp.maximum(h @ w2, 0.0)
    return x + tt


# ----------------------------------- main -----------------------------------

if __name__ == "__main__":
    # Small shapes consistent with the module: 2 bags x 64 instances, C=256
    # features (module default is nChn=512; kernel is shape-generic).
    B, N, C = 2, 64, 256

    root = jax.random.PRNGKey(0)
    k_x, k_w1, k_w2 = jax.random.split(root, 3)

    x = jax.random.normal(k_x, (B, N, C), jnp.float32)
    w1 = 0.05 * jax.random.normal(k_w1, (C, C), jnp.float32)   # Linear 1 (no bias)
    w2 = 0.05 * jax.random.normal(k_w2, (C, C), jnp.float32)   # Linear 2 (no bias)

    # block_m=64 -> 2 grid steps over the flattened 128 rows (exercises the
    # parallel row-tile axis).
    out = residual_block_forward(x, w1, w2, block_m=64)
    out = jax.block_until_ready(out)

    ref = ref_forward(x, w1, w2)
    assert out.shape == (B, N, C)
    assert jnp.allclose(out, ref, atol=1e-4, rtol=1e-4)

    print("KERNEL_OK")
</pallas_src>

<mosaic_0001>
module attributes {stable_mosaic.version = 11 : i64} {
  func.func @_residual_block_kernel(%arg0: i32, %arg1: memref<64x256xf32, #tpu.memory_space<vmem>>, %arg2: memref<256x256xf32, #tpu.memory_space<vmem>>, %arg3: memref<256x256xf32, #tpu.memory_space<vmem>>, %arg4: memref<64x256xf32, #tpu.memory_space<vmem>>) attributes {dimension_semantics = [#tpu.dimension_semantics<parallel>], iteration_bounds = array<i64: 2>, scalar_prefetch = 0 : i64, scratch_operands = 0 : i64, tpu.core_type = #tpu.core_type<tc>, window_params = [{transform_indices = @transform_0, window_bounds = array<i64: 64, 256>}, {pipeline_mode = #tpu.pipeline_mode<synchronous>, transform_indices = @transform_1, window_bounds = array<i64: 256, 256>}, {pipeline_mode = #tpu.pipeline_mode<synchronous>, transform_indices = @transform_2, window_bounds = array<i64: 256, 256>}, {transform_indices = @transform_3, window_bounds = array<i64: 64, 256>}]} {
    %c0 = arith.constant 0 : index
    %c0_0 = arith.constant 0 : index
    %0 = vector.load %arg1[%c0, %c0_0] : memref<64x256xf32, #tpu.memory_space<vmem>>, vector<64x256xf32>
    %c0_1 = arith.constant 0 : index
    %c0_2 = arith.constant 0 : index
    %1 = vector.load %arg2[%c0_1, %c0_2] : memref<256x256xf32, #tpu.memory_space<vmem>>, vector<256x256xf32>
    %cst = arith.constant dense<0.000000e+00> : vector<64x256xf32>
    %2 = tpu.matmul %0, %1, %cst {dimension_numbers = #tpu.dot_dimension_numbers<[1], [0], [0], [1], [0, 0, 1, 1], [], []>} : vector<64x256xf32>, vector<256x256xf32>, vector<64x256xf32> -> vector<64x256xf32>
    %cst_3 = arith.constant 0.000000e+00 : f32
    %3 = vector.broadcast %cst_3 : f32 to vector<64x256xf32>
    %4 = arith.maximumf %2, %3 : vector<64x256xf32>
    %c0_4 = arith.constant 0 : index
    %c0_5 = arith.constant 0 : index
    %5 = vector.load %arg3[%c0_4, %c0_5] : memref<256x256xf32, #tpu.memory_space<vmem>>, vector<256x256xf32>
    %cst_6 = arith.constant dense<0.000000e+00> : vector<64x256xf32>
    %6 = tpu.matmul %4, %5, %cst_6 {dimension_numbers = #tpu.dot_dimension_numbers<[1], [0], [0], [1], [0, 0, 1, 1], [], []>} : vector<64x256xf32>, vector<256x256xf32>, vector<64x256xf32> -> vector<64x256xf32>
    %cst_7 = arith.constant 0.000000e+00 : f32
    %7 = vector.broadcast %cst_7 : f32 to vector<64x256xf32>
    %8 = arith.maximumf %6, %7 : vector<64x256xf32>
    %9 = arith.addf %0, %8 : vector<64x256xf32>
    %c0_8 = arith.constant 0 : index
    %c0_9 = arith.constant 0 : index
    %10 = vector.load %arg4[%c0_8, %c0_9] : memref<64x256xf32, #tpu.memory_space<vmem>>, vector<64x256xf32>
    tpu.vector_store %arg4[%c0_8, %c0_9], %9 {strides = array<i32>} : memref<64x256xf32, #tpu.memory_space<vmem>>, vector<64x256xf32>,
    return
  }
  func.func @transform_0(%arg0: i32) -> (i32, i32) {
    %c0_i32 = arith.constant 0 : i32
    %c0_i32_0 = arith.constant 0 : i32
    return %arg0, %c0_i32 : i32, i32
  }
  func.func @transform_1(%arg0: i32) -> (i32, i32) {
    %c0_i32 = arith.constant 0 : i32
    %c0_i32_0 = arith.constant 0 : i32
    %c0_i32_1 = arith.constant 0 : i32
    return %c0_i32, %c0_i32_0 : i32, i32
  }
  func.func @transform_2(%arg0: i32) -> (i32, i32) {
    %c0_i32 = arith.constant 0 : i32
    %c0_i32_0 = arith.constant 0 : i32
    %c0_i32_1 = arith.constant 0 : i32
    return %c0_i32, %c0_i32_0 : i32, i32
  }
  func.func @transform_3(%arg0: i32) -> (i32, i32) {
    %c0_i32 = arith.constant 0 : i32
    %c0_i32_0 = arith.constant 0 : i32
    return %arg0, %c0_i32 : i32, i32
  }
}

</mosaic_0001>

<bundles_post_ra>
// kernel: tpu_custom_call.1
= control target key start
LH: loop header
LB: loop body
LE: loop exit
PB: predicated region body
PF: predicated region fallthrough
CT: control target
= control target key end

     0   :  { %8 = vsyncpa [#allocation3], 0  ;;  %s1426_s0 = inlined_call_operand.hbm [shape: f32[128,256], index: 0, kind: input, shape index: {}]   ;;  %s1427_s1 = inlined_call_operand.hbm [shape: f32[256,256], index: 1, kind: input, shape index: {}]   ;;  %s1428_s2 = inlined_call_operand.hbm [shape: f32[256,256], index: 2, kind: input, shape index: {}]   ;;  %s1429_s3 = inlined_call_operand.hbm [shape: f32[128,256], index: 3, kind: output, shape index: {}]  }
   0x1   :  { %10 = vsyncpa [#allocation3 + $0x1], 0 }
   0x2   :  { %11 = vsyncpa [#allocation6], 0 }
   0x3   :  { %12 = vsyncpa [#allocation4], 0 }
   0x4   :  { %14 = vsyncpa [#allocation4 + $0x1], 0  ;;  %s1155_s12 = smov 0   ;;  %s1157_s13 = smov 0  }
   0x5   :  { %s1159_s14 = smov 0   ;;  %s1161_s15 = smov 0  }
   0x6 LB: > { %s1176_s16 = sadd.s32 4294967295, %s1127_s15   ;;  %s872_s17 = sadd.s32 4294967294, %s1127_s15   ;;  %s1127_s15 = sphi %s1161_s15, %s1439_s15   ;;  %s1123_s14 = sphi %s1159_s14, %s1438_s14   ;;  %s1119_s13 = sphi %s1157_s13, %s1437_s13   ;;  %s1115_s12 = sphi %s1155_s12, %s1436_s12  }
   0x7   : > { %p40_p0 = scmp.ne.s32.totalorder %s1119_s13, %s1115_s12  ;;  %p41_p1 = scmp.eq.s32.totalorder %s1176_s16, 0 }
   0x8   : > { %p106_p2 = scmp.eq.s32.totalorder %s1176_s16, 1  ;;  %p112_p3 = scmp.eq.s32.totalorder %s872_s17, 1 }
   0x9   : > { %p1185_p4 = por %p41_p1, %p40_p0  ;;  %p873_p5 = scmp.ge.s32.totalorder %s1127_s15, 1 }
   0xa   : > { %p1190_p6 = por %p112_p3, %p40_p0  ;;  %p119_p7 = scmp.lt.s32.totalorder %s1127_s15, 3 }
   0xb   : > { %s130_s22 = sshll.u32 %s1427_s1, 4  ;;  %s1129_s24 = smov [#allocation5]   ;;  %s131_s22 = int_to_ptr.hbm [resolvable:$true] %s130_s22 }
   0xc   : > { %p1198_p8 = pnand %p873_p5, %p119_p7  ;;  %s132_s25 = sshll.u32 %s1129_s24, 4  ;;  %s133_s25 = int_to_ptr.vmem [resolvable:$true] %s132_s25 }
   0xd   : > { %s144_s28 = sshll.u32 %s1428_s2, 4  ;;  %s1130_s29 = smov 256   ;;  %s145_s28 = int_to_ptr.hbm [resolvable:$true] %s144_s28 }
   0xe   : > { %p908_p9 = pneg %p1198_p8  ;;  %s1131_s30 = smov 16  }
   0xf   : > { %s1132_s4 = smov [#allocation7]   ;;  %s1217_s6 = sadd.s32 1, %s1127_s15  }
  0x10   : > { %p909_p10 = pnand %p908_p9, %p41_p1  ;;  %s146_s5 = sshll.u32 %s1132_s4, 4  ;;  %s147_s5 = int_to_ptr.vmem [resolvable:$true] %s146_s5 }
  0x11   : > { %s27_s7 = sadd.s32 1, %s1123_s14  ;;  %s24_s8 = ssub.s32 %s1127_s15, %s1217_s6 }
  0x12   : > { %911 = dma.hbm_to_vmem [thread:$0]  (!%p909_p10), %s131_s22, 8192, %s133_s25, [#allocation6], %s1130_s29, %s1130_s29, %s1131_s30  }
  0x13   : > { %914 = dma.hbm_to_vmem [thread:$0]  (!%p909_p10), %s145_s28, 8192, %s147_s5, [#allocation6], %s1130_s29, %s1130_s29, %s1131_s30  }
  0x14   : > { %p34_p12 = scmp.ne.s32.totalorder %s1123_s14, %s1119_s13  ;;  %p25_p13 = scmp.eq.s32.totalorder %s24_s8, 0 }
  0x15   : > { %p35_p0 = scmp.eq.s32.totalorder %s1127_s15, 0  ;;  %p925_p5 = scmp.lt.s32.totalorder %s1127_s15, 2 }
  0x16   : > { %p1227_p3 = por %p106_p2, %p34_p12  ;;  %s160_s11 = sand.u32 1, %s1123_s14  }
  0x17   : > { %s1233_s10 = scalar_select %p25_p13, %s1123_s14, %s27_s7  }
  0x18   : > { %p36_p7 = por %p35_p0, %p34_p12  ;;  %s877_s17 = sshll.u32 %s160_s11, 7 }
  0x19   : > { %s893_s20 = sshll.u32 %s1127_s15, 7  ;;  %s164_s25 = scalar_lea.vmem [#allocation2], %s877_s17 }
  0x1a   : > { %s170_s24 = scalar_lea.hbm %s1426_s0, %s893_s20  ;;  %s173_s26 = sshll.u32 %s164_s25, 4  ;;  %s174_s26 = int_to_ptr.vmem [resolvable:$true] %s173_s26 }
  0x1b   : > { %s171_s27 = sshll.u32 %s170_s24, 4  ;;  %p1240_p2 = pnand %p925_p5, %p36_p7  ;;  %s172_s27 = int_to_ptr.hbm [resolvable:$true] %s171_s27 }
  0x1c   : > { %s161_s4 = scalar_lea.sflag [#allocation3], %s160_s11  ;;  %s1027_s5 = sshra.s32 %s172_s27, 4  ;;  %s1028_s5 = int_to_ptr.hbm [resolvable:$true] %s1027_s5 }
  0x1d   : > { %s1029_s7 = scalar_lea.hbm %s1028_s5, 128  ;;  %p1031_p10 = pneg %p1240_p2 }
  0x1e   : > { %p1030_p9 = scmp.ne.s32.totalorder %s1028_s5, %s1029_s7  ;;  %s1034_s20 = scalar_lea.hbm %s1426_s0, 256 }
  0x1f   : > { %p1035_p0 = scmp.lt.s32.totalorder %s1028_s5, %s1426_s0  ;;  %p1036_p5 = scmp.lt.s32.totalorder %s1034_s20, %s1029_s7 }
  0x20   : > { %p1032_p12 = pnand %p1031_p10, %p1030_p9 }
  0x21   : > { %p1037_p7 = por %p1036_p5, %p1035_p0 }
  0x22   : > { %p1033_p13 = pneg %p1032_p12 }
  0x24   : > { %p1038_p11 = pnand %p1037_p7, %p1033_p13 }
  0x26   : > { %1041 = shalt.err (!%p1038_p11)
}
  0x27   : > { %918 = dma.hbm_to_vmem [thread:$0]  (!%p1240_p2), %s172_s27, 2048, %s174_s26, %s161_s4, %s1130_s29, %s1130_s29, %s1131_s30  }
  0x28   : > { %185 = sbr.rel (%p1198_p8) target bundleno = 415 (0x19f), region = 32  ;;  %s1260_s11 = sand.u32 (!%p1198_p8), 1, %s1119_s13  }
  0x29   : > { %s882_s24 = sshll.u32 (!%p1198_p8), %s1260_s11, 7  ;;  %s188_s25 = scalar_lea.sflag (!%p1198_p8), [#allocation3], %s1260_s11 }
  0x2a   : > { %s1266_s5 = scalar_lea.vmem (!%p1198_p8), [#allocation2], %s882_s24 }
  0x2d   : > { %1102 = dma.done.wait (%p1185_p4), %s188_s25, 2048  }
  0x2e   : > { %1104 = vsyncadd (%p1185_p4), %s188_s25, 4294965248 }
  0x2f   : > { %1106 = dma.done.wait (%p41_p1), [#allocation6], 16384  }
  0x30   : > { %1108 = vsyncadd (%p41_p1), [#allocation6], 4294950912  ;;  %v274_v0 = vld [vmem:[#allocation5 + $0xf8] sm:$0xff]  ;;  %v272_v2 = vld [vmem:[#allocation5 + $0xe8] sm:$0xff]  ;;  %s1359_s18 = scalar_lea.vmem [#allocation8], %s882_s24  ;;  %s895_s23 = sshll.u32 %s1176_s16, 7 }
  0x31   : > { %v306_v1 = vld [vmem:[#allocation5 + $0x1f8] sm:$0xff]  ;;  %389 = vmatpush.msra.mxu2 %v274_v0  ;;  %v304_v3 = vld [vmem:[#allocation5 + $0x1e8] sm:$0xff]  ;;  %v273_v6 = vld [vmem:[#allocation5 + $0xf0] sm:$0xff]  ;;  %s776_s26 = scalar_lea.hbm %s1429_s3, %s895_s23  ;;  %s777_s27 = sshll.u32 %s1359_s18, 4  ;;  %s778_s27 = int_to_ptr.vmem [resolvable:$true] %s777_s27 }
  0x32   : > { %430 = vmatpush.msra.mxu3 %v306_v1  ;;  %v270_v4 = vld [vmem:[#allocation5 + $0xd8] sm:$0xff]  ;;  %v305_v7 = vld [vmem:[#allocation5 + $0x1f0] sm:$0xff]  ;;  %v271_v8 = vld [vmem:[#allocation5 + $0xe0] sm:$0xff]  ;;  %307 = vmatpush.msra.mxu0 %v273_v6  ;;  %s779_s28 = sshll.u32 %s776_s26, 4  ;;  %s764_s16 = scalar_lea.sflag [#allocation4], %s1260_s11  ;;  %s780_s28 = int_to_ptr.hbm [resolvable:$true] %s779_s28 }
  0x33   : > { %v302_v5 = vld [vmem:[#allocation5 + $0x1d8] sm:$0xff]  ;;  %390 = vmatpush.msra.mxu2 %v272_v2  ;;  %v303_v9 = vld [vmem:[#allocation5 + $0x1e0] sm:$0xff]  ;;  %348 = vmatpush.msra.mxu1 %v305_v7  ;;  %v268_v10 = vld [vmem:[#allocation5 + $0xc8] sm:$0xff]  ;;  %s1071_s4 = sshra.s32 %s780_s28, 4  ;;  %s1077_s20 = scalar_lea.hbm %s1429_s3, 256  ;;  %s1072_s4 = int_to_ptr.hbm [resolvable:$true] %s1071_s4 }
  0x34   : > { %431 = vmatpush.msra.mxu3 %v304_v3  ;;  %v300_v11 = vld [vmem:[#allocation5 + $0x1c8] sm:$0xff]  ;;  %v269_v12 = vld [vmem:[#allocation5 + $0xd0] sm:$0xff]  ;;  %308 = vmatpush.msra.mxu0 %v271_v8  ;;  %v266_v14 = vld [vmem:[#allocation5 + $0xb8] sm:$0xff]  ;;  %s1073_s7 = scalar_lea.hbm %s1072_s4, 128  ;;  %p1078_p11 = scmp.lt.s32.totalorder %s1072_s4, %s1429_s3 }
  0x35   : > { %391 = vmatpush.msra.mxu2 %v270_v4  ;;  %v301_v13 = vld [vmem:[#allocation5 + $0x1d0] sm:$0xff]  ;;  %349 = vmatpush.msra.mxu1 %v303_v9  ;;  %v298_v15 = vld [vmem:[#allocation5 + $0x1b8] sm:$0xff]  ;;  %v267_v16 = vld [vmem:[#allocation5 + $0xc0] sm:$0xff]  ;;  %p1074_p1 = scmp.ne.s32.totalorder %s1072_s4, %s1073_s7  ;;  %p1079_p2 = scmp.lt.s32.totalorder %s1077_s20, %s1073_s7 }
  0x36   : > { %432 = vmatpush.msra.mxu3 %v302_v5  ;;  %v299_v17 = vld [vmem:[#allocation5 + $0x1c0] sm:$0xff]  ;;  %309 = vmatpush.msra.mxu0 %v269_v12  ;;  %v264_v18 = vld [vmem:[#allocation5 + $0xa8] sm:$0xff]  ;;  %v265_v20 = vld [vmem:[#allocation5 + $0xb0] sm:$0xff] }
  0x37   : > { %392 = vmatpush.msra.mxu2 %v268_v10  ;;  %350 = vmatpush.msra.mxu1 %v301_v13  ;;  %v296_v19 = vld [vmem:[#allocation5 + $0x1a8] sm:$0xff]  ;;  %v297_v21 = vld [vmem:[#allocation5 + $0x1b0] sm:$0xff]  ;;  %v262_v22 = vld [vmem:[#allocation5 + $0x98] sm:$0xff]  ;;  %p1075_p4 = pnand %p1074_p1, %p1227_p3  ;;  %p1080_p9 = por %p1079_p2, %p1078_p11 }
  0x38   : > { %433 = vmatpush.msra.mxu3 %v300_v11  ;;  %310 = vmatpush.msra.mxu0 %v267_v16  ;;  %v294_v23 = vld [vmem:[#allocation5 + $0x198] sm:$0xff]  ;;  %v263_v24 = vld [vmem:[#allocation5 + $0xa0] sm:$0xff]  ;;  %v260_v26 = vld [vmem:[#allocation5 + $0x88] sm:$0xff] }
  0x39   : > { %393 = vmatpush.msra.mxu2 %v266_v14  ;;  %351 = vmatpush.msra.mxu1 %v299_v17  ;;  %v295_v25 = vld [vmem:[#allocation5 + $0x1a0] sm:$0xff]  ;;  %v292_v27 = vld [vmem:[#allocation5 + $0x188] sm:$0xff]  ;;  %v261_v28 = vld [vmem:[#allocation5 + $0x90] sm:$0xff]  ;;  %p1076_p8 = pneg %p1075_p4 }
  0x3a   : > { %434 = vmatpush.msra.mxu3 %v298_v15  ;;  %311 = vmatpush.msra.mxu0 %v265_v20  ;;  %v293_v29 = vld [vmem:[#allocation5 + $0x190] sm:$0xff]  ;;  %v258_v30 = vld [vmem:[#allocation5 + $0x78] sm:$0xff]  ;;  %v259_v32 = vld [vmem:[#allocation5 + $0x80] sm:$0xff] }
  0x3b   : > { %394 = vmatpush.msra.mxu2 %v264_v18  ;;  %352 = vmatpush.msra.mxu1 %v297_v21  ;;  %v290_v31 = vld [vmem:[#allocation5 + $0x178] sm:$0xff]  ;;  %v291_v33 = vld [vmem:[#allocation5 + $0x180] sm:$0xff]  ;;  %v256_v34 = vld [vmem:[#allocation5 + $0x68] sm:$0xff]  ;;  %p1081_p10 = pnand %p1080_p9, %p1076_p8 }
  0x3c   : > { %435 = vmatpush.msra.mxu3 %v296_v19  ;;  %312 = vmatpush.msra.mxu0 %v263_v24  ;;  %v288_v35 = vld [vmem:[#allocation5 + $0x168] sm:$0xff]  ;;  %v257_v36 = vld [vmem:[#allocation5 + $0x70] sm:$0xff]  ;;  %v254_v38 = vld [vmem:[#allocation5 + $0x58] sm:$0xff] }
  0x3d   : > { %395 = vmatpush.msra.mxu2 %v262_v22  ;;  %353 = vmatpush.msra.mxu1 %v295_v25  ;;  %v289_v37 = vld [vmem:[#allocation5 + $0x170] sm:$0xff]  ;;  %v286_v39 = vld [vmem:[#allocation5 + $0x158] sm:$0xff]  ;;  %v255_v40 = vld [vmem:[#allocation5 + $0x60] sm:$0xff] }
  0x3e   : > { %436 = vmatpush.msra.mxu3 %v294_v23  ;;  %313 = vmatpush.msra.mxu0 %v261_v28  ;;  %v287_v41 = vld [vmem:[#allocation5 + $0x160] sm:$0xff]  ;;  %v252_v42 = vld [vmem:[#allocation5 + $0x48] sm:$0xff]  ;;  %v253_v44 = vld [vmem:[#allocation5 + $0x50] sm:$0xff] }
  0x3f   : > { %396 = vmatpush.msra.mxu2 %v260_v26  ;;  %354 = vmatpush.msra.mxu1 %v293_v29  ;;  %v284_v43 = vld [vmem:[#allocation5 + $0x148] sm:$0xff]  ;;  %v285_v45 = vld [vmem:[#allocation5 + $0x150] sm:$0xff]  ;;  %v250_v46 = vld [vmem:[#allocation5 + $0x38] sm:$0xff] }
  0x40   : > { %437 = vmatpush.msra.mxu3 %v292_v27  ;;  %314 = vmatpush.msra.mxu0 %v259_v32  ;;  %v282_v47 = vld [vmem:[#allocation5 + $0x138] sm:$0xff]  ;;  %v251_v48 = vld [vmem:[#allocation5 + $0x40] sm:$0xff]  ;;  %v248_v50 = vld [vmem:[#allocation5 + $0x28] sm:$0xff] }
  0x41   : > { %397 = vmatpush.msra.mxu2 %v258_v30  ;;  %355 = vmatpush.msra.mxu1 %v291_v33  ;;  %v283_v49 = vld [vmem:[#allocation5 + $0x140] sm:$0xff]  ;;  %v280_v51 = vld [vmem:[#allocation5 + $0x128] sm:$0xff]  ;;  %v249_v52 = vld [vmem:[#allocation5 + $0x30] sm:$0xff] }
  0x42   : > { %438 = vmatpush.msra.mxu3 %v290_v31  ;;  %315 = vmatpush.msra.mxu0 %v257_v36  ;;  %v281_v53 = vld [vmem:[#allocation5 + $0x130] sm:$0xff]  ;;  %v246_v54 = vld [vmem:[#allocation5 + $0x18] sm:$0xff]  ;;  %v247_v56 = vld [vmem:[#allocation5 + $0x20] sm:$0xff] }
  0x43   : > { %398 = vmatpush.msra.mxu2 %v256_v34  ;;  %356 = vmatpush.msra.mxu1 %v289_v37  ;;  %v278_v55 = vld [vmem:[#allocation5 + $0x118] sm:$0xff]  ;;  %v279_v57 = vld [vmem:[#allocation5 + $0x120] sm:$0xff]  ;;  %v244_v58 = vld [vmem:[#allocation5 + $0x8] sm:$0xff] }
  0x44   : > { %439 = vmatpush.msra.mxu3 %v288_v35  ;;  %316 = vmatpush.msra.mxu0 %v255_v40  ;;  %v276_v59 = vld [vmem:[#allocation5 + $0x108] sm:$0xff]  ;;  %v1277_v60 = vld [vmem:[%s1266_s5] sm:$0xff]  ;;  %v245_v62 = vld [vmem:[#allocation5 + $0x10] sm:$0xff] }
  0x45   : > { %399 = vmatpush.msra.mxu2 %v254_v38  ;;  %357 = vmatpush.msra.mxu1 %v287_v41  ;;  %v1280_v61 = vld [vmem:[%s1266_s5 + $0x8] sm:$0xff]  ;;  %v277_v63 = vld [vmem:[#allocation5 + $0x110] sm:$0xff]  ;;  %v243_v0 = vld [vmem:[#allocation5] sm:$0xff] }
  0x46   : > { %440 = vmatpush.msra.mxu3 %v286_v39  ;;  %317 = vmatpush.msra.mxu0 %v253_v44  ;;  %v275_v1 = vld [vmem:[#allocation5 + $0x100] sm:$0xff]  ;;  %v1287_v2 = vld [vmem:[%s1266_s5 + $0x10] sm:$0xff]  ;;  %v1290_v3 = vld [vmem:[%s1266_s5 + $0x18] sm:$0xff] }
  0x47   : > { %400 = vmatpush.msra.mxu2 %v252_v42  ;;  %358 = vmatpush.msra.mxu1 %v285_v45  ;;  %v1297_v4 = vld [vmem:[%s1266_s5 + $0x20] sm:$0xff]  ;;  %v1300_v5 = vld [vmem:[%s1266_s5 + $0x28] sm:$0xff]  ;;  %v1307_v6 = vld [vmem:[%s1266_s5 + $0x30] sm:$0xff] }
  0x48   : > { %441 = vmatpush.msra.mxu3 %v284_v43  ;;  %318 = vmatpush.msra.mxu0 %v251_v48  ;;  %v1310_v7 = vld [vmem:[%s1266_s5 + $0x38] sm:$0xff]  ;;  %v1315_v8 = vld [vmem:[%s1266_s5 + $0x40] sm:$0xff]  ;;  %v1318_v9 = vld [vmem:[%s1266_s5 + $0x48] sm:$0xff] }
  0x49   : > { %401 = vmatpush.msra.mxu2 %v250_v46  ;;  %359 = vmatpush.msra.mxu1 %v283_v49  ;;  %v518_v10 = vld [vmem:[#allocation7 + $0xf8] sm:$0xff]  ;;  %v516_v12 = vld [vmem:[#allocation7 + $0xe8] sm:$0xff]  ;;  %v517_v14 = vld [vmem:[#allocation7 + $0xf0] sm:$0xff] }
  0x4a   : > { %442 = vmatpush.msra.mxu3 %v282_v47  ;;  %319 = vmatpush.msra.mxu0 %v249_v52  ;;  %v550_v11 = vld [vmem:[#allocation7 + $0x1f8] sm:$0xff]  ;;  %v548_v13 = vld [vmem:[#allocation7 + $0x1e8] sm:$0xff]  ;;  %v549_v15 = vld [vmem:[#allocation7 + $0x1f0] sm:$0xff] }
  0x4b   : > { %402 = vmatpush.msra.mxu2 %v248_v50  ;;  %360 = vmatpush.msra.mxu1 %v281_v53  ;;  %v514_v16 = vld [vmem:[#allocation7 + $0xd8] sm:$0xff]  ;;  %v515_v18 = vld [vmem:[#allocation7 + $0xe0] sm:$0xff]  ;;  %v512_v20 = vld [vmem:[#allocation7 + $0xc8] sm:$0xff] }
  0x4c   : > { %443 = vmatpush.msra.mxu3 %v280_v51  ;;  %320 = vmatpush.msra.mxu0 %v247_v56  ;;  %v546_v17 = vld [vmem:[#allocation7 + $0x1d8] sm:$0xff]  ;;  %v547_v19 = vld [vmem:[#allocation7 + $0x1e0] sm:$0xff]  ;;  %v544_v21 = vld [vmem:[#allocation7 + $0x1c8] sm:$0xff] }
  0x4d   : > { %403 = vmatpush.msra.mxu2 %v246_v54  ;;  %361 = vmatpush.msra.mxu1 %v279_v57  ;;  %v513_v22 = vld [vmem:[#allocation7 + $0xd0] sm:$0xff]  ;;  %v510_v24 = vld [vmem:[#allocation7 + $0xb8] sm:$0xff]  ;;  %v511_v26 = vld [vmem:[#allocation7 + $0xc0] sm:$0xff] }
  0x4e   : > { %444 = vmatpush.msra.mxu3 %v278_v55  ;;  %321 = vmatpush.msra.mxu0 %v245_v62  ;;  %v545_v23 = vld [vmem:[#allocation7 + $0x1d0] sm:$0xff]  ;;  %v542_v25 = vld [vmem:[#allocation7 + $0x1b8] sm:$0xff]  ;;  %v543_v27 = vld [vmem:[#allocation7 + $0x1c0] sm:$0xff] }
  0x4f   : > { %404 = vmatpush.msra.mxu2 %v244_v58  ;;  %362 = vmatpush.msra.mxu1 %v277_v63  ;;  %v1327_v28 = vld [vmem:[%s1266_s5 + $0x50] sm:$0xff]  ;;  %v1330_v29 = vld [vmem:[%s1266_s5 + $0x58] sm:$0xff]  ;;  %v508_v30 = vld [vmem:[#allocation7 + $0xa8] sm:$0xff] }
  0x50   : > { %445 = vmatpush.msra.mxu3 %v276_v59  ;;  %405 = vmatmul.f32.vlgmr.msra.gmra.mxu2 %v1277_v60  ;;  %v540_v31 = vld [vmem:[#allocation7 + $0x1a8] sm:$0xff]  ;;  %v509_v32 = vld [vmem:[#allocation7 + $0xb0] sm:$0xff]  ;;  %v506_v34 = vld [vmem:[#allocation7 + $0x98] sm:$0xff] }
  0x51   : > { %446 = vmatmul.f32.vlgmr.msra.gmra.mxu3 %v1280_v61  ;;  %322 = vmatpush.msra.mxu0 %v243_v0  ;;  %v541_v33 = vld [vmem:[#allocation7 + $0x1b0] sm:$0xff]  ;;  %v538_v35 = vld [vmem:[#allocation7 + $0x198] sm:$0xff]  ;;  %v507_v36 = vld [vmem:[#allocation7 + $0xa0] sm:$0xff] }
  0x52   : > { %363 = vmatpush.msra.mxu1 %v275_v1  ;;  %323 = vmatmul.f32.vlgmr.msra.gmra.mxu0 %v1277_v60  ;;  %v539_v37 = vld [vmem:[#allocation7 + $0x1a0] sm:$0xff]  ;;  %v504_v38 = vld [vmem:[#allocation7 + $0x88] sm:$0xff]  ;;  %v505_v40 = vld [vmem:[#allocation7 + $0x90] sm:$0xff] }
  0x53   : > { %364 = vmatmul.f32.vlgmr.msra.gmra.mxu1 %v1280_v61  ;;  %633 = vmatpush.msrb.mxu2 %v518_v10  ;;  %v536_v39 = vld [vmem:[#allocation7 + $0x188] sm:$0xff]  ;;  %v537_v41 = vld [vmem:[#allocation7 + $0x190] sm:$0xff]  ;;  %v1337_v42 = vld [vmem:[%s1266_s5 + $0x60] sm:$0xff] }
  0x54   : > { %674 = vmatpush.msrb.mxu3 %v550_v11  ;;  %551 = vmatpush.msrb.mxu0 %v517_v14  ;;  %v1340_v43 = vld [vmem:[%s1266_s5 + $0x68] sm:$0xff]  ;;  %v502_v44 = vld [vmem:[#allocation7 + $0x78] sm:$0xff]  ;;  %v503_v46 = vld [vmem:[#allocation7 + $0x80] sm:$0xff] }
  0x55   : > { %592 = vmatpush.msrb.mxu1 %v549_v15  ;;  %634 = vmatpush.msrb.mxu2 %v516_v12  ;;  %v534_v45 = vld [vmem:[#allocation7 + $0x178] sm:$0xff]  ;;  %v535_v47 = vld [vmem:[#allocation7 + $0x180] sm:$0xff]  ;;  %v500_v48 = vld [vmem:[#allocation7 + $0x68] sm:$0xff] }
  0x56   : > { %675 = vmatpush.msrb.mxu3 %v548_v13  ;;  %552 = vmatpush.msrb.mxu0 %v515_v18  ;;  %v532_v49 = vld [vmem:[#allocation7 + $0x168] sm:$0xff]  ;;  %v501_v50 = vld [vmem:[#allocation7 + $0x70] sm:$0xff]  ;;  %v498_v52 = vld [vmem:[#allocation7 + $0x58] sm:$0xff] }
  0x57   : > { %635 = vmatpush.msrb.mxu2 %v514_v16  ;;  %593 = vmatpush.msrb.mxu1 %v547_v19  ;;  %v533_v51 = vld [vmem:[#allocation7 + $0x170] sm:$0xff]  ;;  %v530_v53 = vld [vmem:[#allocation7 + $0x158] sm:$0xff]  ;;  %v499_v54 = vld [vmem:[#allocation7 + $0x60] sm:$0xff] }
  0x58   : > { %408 = vmatmul.f32.gmra.mxu2 %v1287_v2  ;;  %676 = vmatpush.msrb.mxu3 %v546_v17  ;;  %v531_v55 = vld [vmem:[#allocation7 + $0x160] sm:$0xff]  ;;  %v1347_v56 = vld [vmem:[%s1266_s5 + $0x70] sm:$0xff]  ;;  %v1350_v57 = vld [vmem:[%s1266_s5 + $0x78] sm:$0xff] }
  0x59   : > { %449 = vmatmul.f32.gmra.mxu3 %v1290_v3  ;;  %636 = vmatpush.msrb.mxu2 %v512_v20  ;;  %v496_v58 = vld [vmem:[#allocation7 + $0x48] sm:$0xff]  ;;  %v497_v62 = vld [vmem:[#allocation7 + $0x50] sm:$0xff]  ;;  %v494_v0 = vld [vmem:[#allocation7 + $0x38] sm:$0xff] }
  0x5a   : > { %326 = vmatmul.f32.gmra.mxu0 %v1287_v2  ;;  %677 = vmatpush.msrb.mxu3 %v544_v21  ;;  %v528_v59 = vld [vmem:[#allocation7 + $0x148] sm:$0xff]  ;;  %v529_v63 = vld [vmem:[#allocation7 + $0x150] sm:$0xff]  ;;  %v526_v1 = vld [vmem:[#allocation7 + $0x138] sm:$0xff] }
  0x5b   : > { %367 = vmatmul.f32.gmra.mxu1 %v1290_v3  ;;  %553 = vmatpush.msrb.mxu0 %v513_v22  ;;  %v495_v10 = vld [vmem:[#allocation7 + $0x40] sm:$0xff]  ;;  %v492_v12 = vld [vmem:[#allocation7 + $0x28] sm:$0xff]  ;;  %v493_v14 = vld [vmem:[#allocation7 + $0x30] sm:$0xff] }
  0x5c   : > { %594 = vmatpush.msrb.mxu1 %v545_v23  ;;  %637 = vmatpush.msrb.mxu2 %v510_v24  ;;  %v527_v11 = vld [vmem:[#allocation7 + $0x140] sm:$0xff]  ;;  %v524_v13 = vld [vmem:[#allocation7 + $0x128] sm:$0xff]  ;;  %v525_v15 = vld [vmem:[#allocation7 + $0x130] sm:$0xff] }
  0x5d   : > { %678 = vmatpush.msrb.mxu3 %v542_v25  ;;  %554 = vmatpush.msrb.mxu0 %v511_v26  ;;  %v490_v16 = vld [vmem:[#allocation7 + $0x18] sm:$0xff]  ;;  %v491_v18 = vld [vmem:[#allocation7 + $0x20] sm:$0xff]  ;;  %v489_v20 = vld [vmem:[#allocation7 + $0x10] sm:$0xff] }
  0x5e   : > { %595 = vmatpush.msrb.mxu1 %v543_v27  ;;  %638 = vmatpush.msrb.mxu2 %v508_v30  ;;  %v522_v17 = vld [vmem:[#allocation7 + $0x118] sm:$0xff]  ;;  %v523_v19 = vld [vmem:[#allocation7 + $0x120] sm:$0xff]  ;;  %v521_v21 = vld [vmem:[#allocation7 + $0x110] sm:$0xff] }
  0x5f   : > { %679 = vmatpush.msrb.mxu3 %v540_v31  ;;  %555 = vmatpush.msrb.mxu0 %v509_v32  ;;  %v488_v22 = vld [vmem:[#allocation7 + $0x8] sm:$0xff]  ;;  %v487_v24 = vld [vmem:[#allocation7] sm:$0xff] }
  0x60   : > { %411 = vmatmul.f32.gmra.mxu2 %v1297_v4  ;;  %596 = vmatpush.msrb.mxu1 %v541_v33  ;;  %v520_v23 = vld [vmem:[#allocation7 + $0x108] sm:$0xff]  ;;  %v519_v25 = vld [vmem:[#allocation7 + $0x100] sm:$0xff] }
  0x61   : > { %452 = vmatmul.f32.gmra.mxu3 %v1300_v5  ;;  %639 = vmatpush.msrb.mxu2 %v506_v34 }
  0x62   : > { %329 = vmatmul.f32.gmra.mxu0 %v1297_v4  ;;  %680 = vmatpush.msrb.mxu3 %v538_v35 }
  0x63   : > { %370 = vmatmul.f32.gmra.mxu1 %v1300_v5  ;;  %556 = vmatpush.msrb.mxu0 %v507_v36 }
  0x64   : > { %597 = vmatpush.msrb.mxu1 %v539_v37  ;;  %640 = vmatpush.msrb.mxu2 %v504_v38 }
  0x65   : > { %681 = vmatpush.msrb.mxu3 %v536_v39  ;;  %557 = vmatpush.msrb.mxu0 %v505_v40 }
  0x66   : > { %598 = vmatpush.msrb.mxu1 %v537_v41  ;;  %641 = vmatpush.msrb.mxu2 %v502_v44 }
  0x67   : > { %682 = vmatpush.msrb.mxu3 %v534_v45  ;;  %558 = vmatpush.msrb.mxu0 %v503_v46 }
  0x68   : > { %414 = vmatmul.f32.gmra.mxu2 %v1307_v6  ;;  %599 = vmatpush.msrb.mxu1 %v535_v47 }
  0x69   : > { %455 = vmatmul.f32.gmra.mxu3 %v1310_v7  ;;  %642 = vmatpush.msrb.mxu2 %v500_v48 }
  0x6a   : > { %332 = vmatmul.f32.gmra.mxu0 %v1307_v6  ;;  %683 = vmatpush.msrb.mxu3 %v532_v49 }
  0x6b   : > { %373 = vmatmul.f32.gmra.mxu1 %v1310_v7  ;;  %559 = vmatpush.msrb.mxu0 %v501_v50 }
  0x6c   : > { %600 = vmatpush.msrb.mxu1 %v533_v51  ;;  %643 = vmatpush.msrb.mxu2 %v498_v52 }
  0x6d   : > { %684 = vmatpush.msrb.mxu3 %v530_v53  ;;  %560 = vmatpush.msrb.mxu0 %v499_v54 }
  0x6e   : > { %601 = vmatpush.msrb.mxu1 %v531_v55  ;;  %644 = vmatpush.msrb.mxu2 %v496_v58 }
  0x6f   : > { %685 = vmatpush.msrb.mxu3 %v528_v59  ;;  %561 = vmatpush.msrb.mxu0 %v497_v62 }
  0x70   : > { %417 = vmatmul.f32.gmra.mxu2 %v1315_v8  ;;  %602 = vmatpush.msrb.mxu1 %v529_v63 }
  0x71   : > { %458 = vmatmul.f32.gmra.mxu3 %v1318_v9  ;;  %645 = vmatpush.msrb.mxu2 %v494_v0 }
  0x72   : > { %335 = vmatmul.f32.gmra.mxu0 %v1315_v8  ;;  %686 = vmatpush.msrb.mxu3 %v526_v1 }
  0x73   : > { %376 = vmatmul.f32.gmra.mxu1 %v1318_v9  ;;  %562 = vmatpush.msrb.mxu0 %v495_v10 }
  0x74   : > { %603 = vmatpush.msrb.mxu1 %v527_v11  ;;  %646 = vmatpush.msrb.mxu2 %v492_v12 }
  0x75   : > { %687 = vmatpush.msrb.mxu3 %v524_v13  ;;  %563 = vmatpush.msrb.mxu0 %v493_v14 }
  0x76   : > { %604 = vmatpush.msrb.mxu1 %v525_v15  ;;  %647 = vmatpush.msrb.mxu2 %v490_v16 }
  0x77   : > { %688 = vmatpush.msrb.mxu3 %v522_v17  ;;  %564 = vmatpush.msrb.mxu0 %v491_v18 }
  0x78   : > { %420 = vmatmul.f32.gmra.mxu2 %v1327_v28  ;;  %605 = vmatpush.msrb.mxu1 %v523_v19 }
  0x79   : > { %461 = vmatmul.f32.gmra.mxu3 %v1330_v29  ;;  %565 = vmatpush.msrb.mxu0 %v489_v20 }
  0x7a   : > { %338 = vmatmul.f32.gmra.mxu0 %v1327_v28  ;;  %606 = vmatpush.msrb.mxu1 %v521_v21 }
  0x7b   : > { %379 = vmatmul.f32.gmra.mxu1 %v1330_v29  ;;  %648 = vmatpush.msrb.mxu2 %v488_v22 }
  0x7c   : > { %689 = vmatpush.msrb.mxu3 %v520_v23  ;;  %566 = vmatpush.msrb.mxu0 %v487_v24 }
  0x7d   : > { %607 = vmatpush.msrb.mxu1 %v519_v25 }
  0x80   : > { %423 = vmatmul.f32.gmra.mxu2 %v1337_v42 }
  0x81   : > { %464 = vmatmul.f32.gmra.mxu3 %v1340_v43 }
  0x82   : > { %341 = vmatmul.f32.gmra.mxu0 %v1337_v42 }
  0x83   : > { %382 = vmatmul.f32.gmra.mxu1 %v1340_v43 }
  0x88   : > { %426 = vmatmul.f32.gmra.mxu2 %v1347_v56 }
  0x89   : > { %467 = vmatmul.f32.gmra.mxu3 %v1350_v57 }
  0x8a   : > { %344 = vmatmul.f32.gmra.mxu0 %v1347_v56 }
  0x8b   : > { %385 = vmatmul.f32.gmra.mxu1 %v1350_v57 }
  0xcf   : > { %v324_v26 = vpop.f32.mrf.mxu0 }
  0xd0   : > { %v365_v27 = vpop.f32.mrf.mxu1 }
  0xd1   : > { %v366_v30 = vadd.f32 %v365_v27, %v324_v26 }
  0xd3   : > { %v406_v31 = vpop.f32.mrf.mxu2  ;;  %v471_v33 = vmax.f32 %v366_v30, 0.0 }
  0xd4   : > { %v447_v32 = vpop.f32.mrf.mxu3 }
  0xd5   : > { %v448_v34 = vadd.f32 %v447_v32, %v406_v31  ;;  %567 = vmatmul.f32.vlgmr.msrb.gmra.mxu0 %v471_v33  ;;  %649 = vmatmul.f32.vlgmr.msrb.gmra.mxu2 %v471_v33 }
  0xd7   : > { %v472_v35 = vmax.f32 %v448_v34, 0.0  ;;  %v327_v36 = vpop.f32.mrf.mxu0 }
  0xd8   : > { %v368_v37 = vpop.f32.mrf.mxu1 }
  0xd9   : > { %608 = vmatmul.f32.vlgmr.msrb.gmra.mxu1 %v472_v35  ;;  %690 = vmatmul.f32.vlgmr.msrb.gmra.mxu3 %v472_v35  ;;  %v369_v38 = vadd.f32 %v368_v37, %v327_v36 }
  0xdb   : > { %v409_v39 = vpop.f32.mrf.mxu2  ;;  %v473_v41 = vmax.f32 %v369_v38, 0.0 }
  0xdc   : > { %v450_v40 = vpop.f32.mrf.mxu3 }
  0xdd   : > { %v451_v44 = vadd.f32 %v450_v40, %v409_v39  ;;  %570 = vmatmul.f32.gmra.mxu0 %v473_v41  ;;  %652 = vmatmul.f32.gmra.mxu2 %v473_v41 }
  0xdf   : > { %v474_v45 = vmax.f32 %v451_v44, 0.0  ;;  %v330_v46 = vpop.f32.mrf.mxu0 }
  0xe0   : > { %v371_v47 = vpop.f32.mrf.mxu1 }
  0xe1   : > { %611 = vmatmul.f32.gmra.mxu1 %v474_v45  ;;  %693 = vmatmul.f32.gmra.mxu3 %v474_v45  ;;  %v372_v48 = vadd.f32 %v371_v47, %v330_v46 }
  0xe3   : > { %v412_v49 = vpop.f32.mrf.mxu2  ;;  %v475_v51 = vmax.f32 %v372_v48, 0.0 }
  0xe4   : > { %v453_v50 = vpop.f32.mrf.mxu3 }
  0xe5   : > { %v454_v52 = vadd.f32 %v453_v50, %v412_v49  ;;  %573 = vmatmul.f32.gmra.mxu0 %v475_v51  ;;  %655 = vmatmul.f32.gmra.mxu2 %v475_v51 }
  0xe7   : > { %v476_v53 = vmax.f32 %v454_v52, 0.0  ;;  %v333_v54 = vpop.f32.mrf.mxu0 }
  0xe8   : > { %v374_v55 = vpop.f32.mrf.mxu1 }
  0xe9   : > { %614 = vmatmul.f32.gmra.mxu1 %v476_v53  ;;  %696 = vmatmul.f32.gmra.mxu3 %v476_v53  ;;  %v375_v58 = vadd.f32 %v374_v55, %v333_v54 }
  0xeb   : > { %v415_v59 = vpop.f32.mrf.mxu2  ;;  %v477_v63 = vmax.f32 %v375_v58, 0.0 }
  0xec   : > { %v456_v62 = vpop.f32.mrf.mxu3 }
  0xed   : > { %v457_v0 = vadd.f32 %v456_v62, %v415_v59  ;;  %576 = vmatmul.f32.gmra.mxu0 %v477_v63  ;;  %658 = vmatmul.f32.gmra.mxu2 %v477_v63 }
  0xef   : > { %v478_v1 = vmax.f32 %v457_v0, 0.0  ;;  %v336_v10 = vpop.f32.mrf.mxu0 }
  0xf0   : > { %v377_v11 = vpop.f32.mrf.mxu1 }
  0xf1   : > { %617 = vmatmul.f32.gmra.mxu1 %v478_v1  ;;  %699 = vmatmul.f32.gmra.mxu3 %v478_v1  ;;  %v378_v12 = vadd.f32 %v377_v11, %v336_v10 }
  0xf3   : > { %v418_v13 = vpop.f32.mrf.mxu2  ;;  %v479_v15 = vmax.f32 %v378_v12, 0.0 }
  0xf4   : > { %v459_v14 = vpop.f32.mrf.mxu3 }
  0xf5   : > { %v460_v16 = vadd.f32 %v459_v14, %v418_v13  ;;  %579 = vmatmul.f32.gmra.mxu0 %v479_v15  ;;  %661 = vmatmul.f32.gmra.mxu2 %v479_v15 }
  0xf7   : > { %v480_v17 = vmax.f32 %v460_v16, 0.0  ;;  %v339_v18 = vpop.f32.mrf.mxu0 }
  0xf8   : > { %v380_v19 = vpop.f32.mrf.mxu1 }
  0xf9   : > { %620 = vmatmul.f32.gmra.mxu1 %v480_v17  ;;  %702 = vmatmul.f32.gmra.mxu3 %v480_v17  ;;  %v381_v20 = vadd.f32 %v380_v19, %v339_v18 }
  0xfb   : > { %v421_v21 = vpop.f32.mrf.mxu2  ;;  %v481_v23 = vmax.f32 %v381_v20, 0.0 }
  0xfc   : > { %v462_v22 = vpop.f32.mrf.mxu3 }
  0xfd   : > { %v463_v24 = vadd.f32 %v462_v22, %v421_v21  ;;  %582 = vmatmul.f32.gmra.mxu0 %v481_v23  ;;  %664 = vmatmul.f32.gmra.mxu2 %v481_v23 }
  0xff   : > { %v482_v25 = vmax.f32 %v463_v24, 0.0  ;;  %v342_v26 = vpop.f32.mrf.mxu0 }
 0x100   : > { %v383_v27 = vpop.f32.mrf.mxu1 }
 0x101   : > { %623 = vmatmul.f32.gmra.mxu1 %v482_v25  ;;  %705 = vmatmul.f32.gmra.mxu3 %v482_v25  ;;  %v384_v30 = vadd.f32 %v383_v27, %v342_v26 }
 0x103   : > { %v424_v31 = vpop.f32.mrf.mxu2  ;;  %v483_v33 = vmax.f32 %v384_v30, 0.0 }
 0x104   : > { %v465_v32 = vpop.f32.mrf.mxu3 }
 0x105   : > { %v466_v34 = vadd.f32 %v465_v32, %v424_v31  ;;  %585 = vmatmul.f32.gmra.mxu0 %v483_v33  ;;  %667 = vmatmul.f32.gmra.mxu2 %v483_v33 }
 0x107   : > { %v484_v35 = vmax.f32 %v466_v34, 0.0  ;;  %v345_v36 = vpop.f32.mrf.mxu0 }
 0x108   : > { %v386_v37 = vpop.f32.mrf.mxu1 }
 0x109   : > { %626 = vmatmul.f32.gmra.mxu1 %v484_v35  ;;  %708 = vmatmul.f32.gmra.mxu3 %v484_v35  ;;  %v387_v38 = vadd.f32 %v386_v37, %v345_v36 }
 0x10b   : > { %v427_v39 = vpop.f32.mrf.mxu2  ;;  %v485_v41 = vmax.f32 %v387_v38, 0.0 }
 0x10c   : > { %v468_v40 = vpop.f32.mrf.mxu3 }
 0x10d   : > { %v469_v44 = vadd.f32 %v468_v40, %v427_v39  ;;  %588 = vmatmul.f32.gmra.mxu0 %v485_v41  ;;  %670 = vmatmul.f32.gmra.mxu2 %v485_v41 }
 0x10f   : > { %v486_v45 = vmax.f32 %v469_v44, 0.0 }
 0x111   : > { %629 = vmatmul.f32.gmra.mxu1 %v486_v45  ;;  %711 = vmatmul.f32.gmra.mxu3 %v486_v45 }
 0x152   : > { %v568_v46 = vpop.f32.mrf.mxu0 }
 0x156   : > { %v609_v47 = vpop.f32.mrf.mxu1 }
 0x157   : > { %v610_v48 = vadd.f32 %v609_v47, %v568_v46 }
 0x158   : > { %v650_v50 = vpop.f32.mrf.mxu2 }
 0x159   : > { %v715_v49 = vmax.f32 %v610_v48, 0.0 }
 0x15a   : > { %v571_v53 = vpop.f32.mrf.mxu0 }
 0x15b   : > { %v731_v51 = vadd.f32 %v715_v49, %v1277_v60 }
 0x15c   : > { %v691_v52 = vpop.f32.mrf.mxu3 }
 0x15d   : > { %747 = vst [vmem:[%s1359_s18] sm:$0xff] %v731_v51  ;;  %v692_v54 = vadd.f32 %v691_v52, %v650_v50 }
 0x15e   : > { %v612_v55 = vpop.f32.mrf.mxu1 }
 0x15f   : > { %v716_v58 = vmax.f32 %v692_v54, 0.0  ;;  %v613_v59 = vadd.f32 %v612_v55, %v571_v53 }
 0x160   : > { %v653_v0 = vpop.f32.mrf.mxu2 }
 0x161   : > { %v732_v62 = vadd.f32 %v716_v58, %v1280_v61  ;;  %v717_v63 = vmax.f32 %v613_v59, 0.0 }
 0x162   : > { %v574_v10 = vpop.f32.mrf.mxu0 }
 0x163   : > { %748 = vst [vmem:[%s1359_s18 + $0x8] sm:$0xff] %v732_v62  ;;  %v733_v60 = vadd.f32 %v717_v63, %v1287_v2 }
 0x164   : > { %v694_v1 = vpop.f32.mrf.mxu3 }
 0x165   : > { %749 = vst [vmem:[%s1359_s18 + $0x10] sm:$0xff] %v733_v60  ;;  %v695_v11 = vadd.f32 %v694_v1, %v653_v0 }
 0x166   : > { %v615_v12 = vpop.f32.mrf.mxu1 }
 0x167   : > { %v718_v13 = vmax.f32 %v695_v11, 0.0  ;;  %v616_v14 = vadd.f32 %v615_v12, %v574_v10 }
 0x168   : > { %v656_v17 = vpop.f32.mrf.mxu2 }
 0x169   : > { %v734_v15 = vadd.f32 %v718_v13, %v1290_v3  ;;  %v719_v16 = vmax.f32 %v616_v14, 0.0 }
 0x16a   : > { %v577_v19 = vpop.f32.mrf.mxu0 }
 0x16b   : > { %750 = vst [vmem:[%s1359_s18 + $0x18] sm:$0xff] %v734_v15  ;;  %v735_v61 = vadd.f32 %v719_v16, %v1297_v4 }
 0x16c   : > { %v697_v18 = vpop.f32.mrf.mxu3 }
 0x16d   : > { %751 = vst [vmem:[%s1359_s18 + $0x20] sm:$0xff] %v735_v61  ;;  %v698_v2 = vadd.f32 %v697_v18, %v656_v17 }
 0x16e   : > { %v618_v20 = vpop.f32.mrf.mxu1 }
 0x16f   : > { %v720_v21 = vmax.f32 %v698_v2, 0.0  ;;  %v619_v22 = vadd.f32 %v618_v20, %v577_v19 }
 0x170   : > { %v659_v25 = vpop.f32.mrf.mxu2 }
 0x171   : > { %v736_v23 = vadd.f32 %v720_v21, %v1300_v5  ;;  %v721_v24 = vmax.f32 %v619_v22, 0.0 }
 0x172   : > { %v580_v27 = vpop.f32.mrf.mxu0 }
 0x173   : > { %752 = vst [vmem:[%s1359_s18 + $0x28] sm:$0xff] %v736_v23  ;;  %v737_v3 = vadd.f32 %v721_v24, %v1307_v6 }
 0x174   : > { %v700_v26 = vpop.f32.mrf.mxu3 }
 0x175   : > { %753 = vst [vmem:[%s1359_s18 + $0x30] sm:$0xff] %v737_v3  ;;  %v701_v4 = vadd.f32 %v700_v26, %v659_v25 }
 0x176   : > { %v621_v30 = vpop.f32.mrf.mxu1 }
 0x177   : > { %v722_v31 = vmax.f32 %v701_v4, 0.0  ;;  %v622_v32 = vadd.f32 %v621_v30, %v580_v27 }
 0x178   : > { %v662_v35 = vpop.f32.mrf.mxu2 }
 0x179   : > { %v738_v33 = vadd.f32 %v722_v31, %v1310_v7  ;;  %v723_v34 = vmax.f32 %v622_v32, 0.0 }
 0x17a   : > { %v583_v37 = vpop.f32.mrf.mxu0 }
 0x17b   : > { %754 = vst [vmem:[%s1359_s18 + $0x38] sm:$0xff] %v738_v33  ;;  %v739_v5 = vadd.f32 %v723_v34, %v1315_v8 }
 0x17c   : > { %v703_v36 = vpop.f32.mrf.mxu3 }
 0x17d   : > { %755 = vst [vmem:[%s1359_s18 + $0x40] sm:$0xff] %v739_v5  ;;  %v704_v6 = vadd.f32 %v703_v36, %v662_v35 }
 0x17e   : > { %v624_v38 = vpop.f32.mrf.mxu1 }
 0x17f   : > { %v724_v39 = vmax.f32 %v704_v6, 0.0  ;;  %v625_v40 = vadd.f32 %v624_v38, %v583_v37 }
 0x180   : > { %v665_v45 = vpop.f32.mrf.mxu2 }
 0x181   : > { %v740_v41 = vadd.f32 %v724_v39, %v1318_v9  ;;  %v725_v44 = vmax.f32 %v625_v40, 0.0 }
 0x182   : > { %v586_v47 = vpop.f32.mrf.mxu0 }
 0x183   : > { %756 = vst [vmem:[%s1359_s18 + $0x48] sm:$0xff] %v740_v41  ;;  %v741_v7 = vadd.f32 %v725_v44, %v1327_v28 }
 0x184   : > { %v706_v46 = vpop.f32.mrf.mxu3 }
 0x185   : > { %757 = vst [vmem:[%s1359_s18 + $0x50] sm:$0xff] %v741_v7  ;;  %v707_v8 = vadd.f32 %v706_v46, %v665_v45 }
 0x186   : > { %v627_v48 = vpop.f32.mrf.mxu1 }
 0x187   : > { %v726_v49 = vmax.f32 %v707_v8, 0.0  ;;  %v628_v50 = vadd.f32 %v627_v48, %v586_v47 }
 0x188   : > { %v668_v53 = vpop.f32.mrf.mxu2 }
 0x189   : > { %v742_v51 = vadd.f32 %v726_v49, %v1330_v29  ;;  %v727_v52 = vmax.f32 %v628_v50, 0.0 }
 0x18a   : > { %v589_v55 = vpop.f32.mrf.mxu0 }
 0x18b   : > { %758 = vst [vmem:[%s1359_s18 + $0x58] sm:$0xff] %v742_v51  ;;  %v743_v9 = vadd.f32 %v727_v52, %v1337_v42 }
 0x18c   : > { %v709_v54 = vpop.f32.mrf.mxu3 }
 0x18d   : > { %759 = vst [vmem:[%s1359_s18 + $0x60] sm:$0xff] %v743_v9  ;;  %v710_v28 = vadd.f32 %v709_v54, %v668_v53 }
 0x18e   : > { %v630_v58 = vpop.f32.mrf.mxu1 }
 0x18f   : > { %v728_v59 = vmax.f32 %v710_v28, 0.0  ;;  %v631_v62 = vadd.f32 %v630_v58, %v589_v55 }
 0x190   : > { %v671_v0 = vpop.f32.mrf.mxu2 }
 0x191   : > { %v744_v63 = vadd.f32 %v728_v59, %v1340_v43  ;;  %v729_v29 = vmax.f32 %v631_v62, 0.0 }
 0x193   : > { %760 = vst [vmem:[%s1359_s18 + $0x68] sm:$0xff] %v744_v63  ;;  %v745_v42 = vadd.f32 %v729_v29, %v1347_v56 }
 0x194   : > { %v712_v60 = vpop.f32.mrf.mxu3 }
 0x195   : > { %761 = vst [vmem:[%s1359_s18 + $0x70] sm:$0xff] %v745_v42  ;;  %v713_v1 = vadd.f32 %v712_v60, %v671_v0 }
 0x197   : > { %v730_v10 = vmax.f32 %v713_v1, 0.0 }
 0x199   : > { %v746_v43 = vadd.f32 %v730_v10, %v1350_v57 }
 0x19b   : > { %762 = vst [vmem:[%s1359_s18 + $0x78] sm:$0xff] %v746_v43 }
 0x19c   : > { %1084 = shalt.err (!%p1081_p10)
}
 0x19d   : > { %s1133_s11 = smov 256   ;;  %s1134_s24 = smov 16  }
 0x19e   : > { %906 = dma.vmem_to_hbm [thread:$0]  (%p1227_p3), %s778_s27, 2048, %s780_s28, %s764_s16, %s1133_s11, %s1133_s11, %s1134_s24  }
 0x19f PF: > { %s794_s25 = sand.u32 1, %s1115_s12   ;;  %p1435_p12 = scmp.ge.s32.totalorder %s1127_s15, 2 }
 0x1a0   : > { %s795_s5 = scalar_lea.sflag [#allocation4], %s794_s25 }
 0x1a1   : > { %p920_p13 = pnand %p1435_p12, %p1190_p6 }
 0x1a3   : > { %p921_p0 = pneg %p920_p13 }
 0x1a5   : > { %1110 = dma.done.wait (%p921_p0), %s795_s5, 2048  }
 0x1a6   : > { %1112 = vsyncadd (%p921_p0), %s795_s5, 4294965248  ;;  %p17_p5 = scmp.ge.s32.totalorder %s1217_s6, 4   ;;  %s1436_s12 = smov %s1119_s13 }
 0x1a7   : > { %s1437_s13 = smov %s1123_s14  ;;  %s1438_s14 = smov %s1233_s10 }
 0x1a8   : > { %s1439_s15 = smov %s1217_s6  ;;  %19 = sbr.rel (!%p17_p5) target bundleno = 6 (0x6), region = 85 }
 0x1ad   :  { %801 = vsyncpa [#allocation3], 1 }
 0x1ae   :  { %803 = vsyncpa [#allocation3 + $0x1], 1 }
 0x1af   :  { %804 = vsyncpa [#allocation6], 1 }
 0x1b0   :  { %805 = vsyncpa [#allocation4], 1 }
 0x1b1   :  { %807 = vsyncpa [#allocation4 + $0x1], 1 }

</bundles_post_ra>
